<compile_context>
chip_gen: v5e
topology: v5e:2x2
jax: 0.10.0
libtpu: 0.0.40
codegen_flags: <defaults>
</compile_context>

<pallas_src>
import jax
import jax.numpy as jnp
from jax.experimental import pallas as pl
from jax.experimental.pallas import tpu as pltpu


def _round_up(x, m):
    return (x + m - 1) // m * m


def _tensorcores_per_chip():
    """2 on megacore / multi-TC chips (v4, v5p, v7x), else 1."""
    try:
        kind = jax.devices()[0].device_kind.lower()
    except Exception:
        return 1
    return 2 if any(t in kind for t in ("v4", "v5p", "v7", "7x")) else 1


def _fwm_mlp_kernel(s_ref, a_ref, w1_ref, b1_ref, w2_ref, b2_ref,
                    w3_ref, b3_ref, o_ref, x_scratch):
    """Fused 3-layer MLP on one batch tile (weights resident in VMEM)."""
    latent = s_ref.shape[1]
    d_in = x_scratch.shape[1]

    # Pack [state || action] into one (tb, d_in) f32 scratch so layer 1 is a
    # single MXU pass over the full contraction (no wasted pass on K=8).
    x_scratch[:, 0:latent] = s_ref[...]
    x_scratch[:, latent:d_in] = a_ref[...]
    x = x_scratch[...].astype(w1_ref.dtype)      # in-kernel bf16 cast (VPU)

    # Layer 1: bf16 x bf16 -> f32 accumulation on the MXU, bias/ReLU in f32.
    h1 = jnp.dot(x, w1_ref[...], preferred_element_type=jnp.float32) + b1_ref[...]
    h1 = jnp.maximum(h1, 0.0)

    # Layer 2.
    h2 = jnp.dot(h1.astype(w2_ref.dtype), w2_ref[...],
                 preferred_element_type=jnp.float32) + b2_ref[...]
    h2 = jnp.maximum(h2, 0.0)

    # Layer 3 (no activation).
    y = jnp.dot(h2.astype(w3_ref.dtype), w3_ref[...],
                preferred_element_type=jnp.float32) + b3_ref[...]
    o_ref[...] = y.astype(o_ref.dtype)


def prepare_fwm_params(params, compute_dtype=jnp.bfloat16):
    """One-time weight prep, hoisted out of the per-step call path.

    Matmul weights -> bf16 (MXU fast path), biases -> f32 rows of shape (1, out).
    Weights are (in_features, out_features)."""
    return {
        "w1": params["w1"].astype(compute_dtype),
        "w2": params["w2"].astype(compute_dtype),
        "w3": params["w3"].astype(compute_dtype),
        "b1": params["b1"].reshape(1, -1).astype(jnp.float32),
        "b2": params["b2"].reshape(1, -1).astype(jnp.float32),
        "b3": params["b3"].reshape(1, -1).astype(jnp.float32),
    }


def fwm_dynamics_forward(state, action, prepared, *, batch_tile=1024):
    """state: (B, latent_dim) f32, action: (B, action_dim) f32 -> (B, latent_dim)."""
    B, latent_dim = state.shape
    action_dim = action.shape[1]
    d_in = latent_dim + action_dim

    w1, b1 = prepared["w1"], prepared["b1"]
    w2, b2 = prepared["w2"], prepared["b2"]
    w3, b3 = prepared["w3"], prepared["b3"]
    hidden = w1.shape[1]
    out_latent = w3.shape[1]

    # Batch tiling. Single-TC chips (v5e/v6e): one big tile per step (extra
    # grid steps are pure serial overhead). Multi-TC chips (v7x megacore):
    # keep the number of grid steps a multiple of the core count so both
    # TensorCores get balanced work under dimension_semantics=("parallel",).
    tb = max(8, min(_round_up(batch_tile, 8), _round_up(B, 8)))
    ncores = _tensorcores_per_chip()
    if ncores > 1 and B >= 256:
        steps = _round_up(max(pl.cdiv(B, tb), ncores), ncores)
        tb = _round_up(pl.cdiv(B, steps), 8)
    grid = (pl.cdiv(B, tb),)

    flops = 2 * B * (d_in * hidden + hidden * hidden + hidden * out_latent)
    bytes_accessed = (
        B * d_in * 4                                                # f32 acts in
        + B * out_latent * 4                                        # f32 acts out
        + (d_in * hidden + hidden * hidden + hidden * out_latent) * 2  # bf16 weights
        + (2 * hidden + out_latent) * 4)                            # f32 biases

    # NOTE: weight/bias specs map to block (0,0) every step; pl.Buffered(1)
    # single-buffering would save ~170 KB of duplicate VMEM but is left off
    # (tiny win, extra API surface). VMEM stays well inside the 32 MiB scoped
    # default at tb<=1024 even on v7x, so vmem_limit_bytes is not raised.
    out = pl.pallas_call(
        _fwm_mlp_kernel,
        out_shape=jax.ShapeDtypeStruct((B, out_latent), state.dtype),
        grid_spec=pltpu.PrefetchScalarGridSpec(
            num_scalar_prefetch=0,
            grid=grid,
            in_specs=[
                pl.BlockSpec((tb, latent_dim), lambda i: (i, 0)),      # state tile
                pl.BlockSpec((tb, action_dim), lambda i: (i, 0)),      # action tile
                pl.BlockSpec((d_in, hidden), lambda i: (0, 0)),        # W1 (full)
                pl.BlockSpec((1, hidden), lambda i: (0, 0)),           # b1
                pl.BlockSpec((hidden, hidden), lambda i: (0, 0)),      # W2
                pl.BlockSpec((1, hidden), lambda i: (0, 0)),           # b2
                pl.BlockSpec((hidden, out_latent), lambda i: (0, 0)),  # W3
                pl.BlockSpec((1, out_latent), lambda i: (0, 0)),       # b3
            ],
            out_specs=pl.BlockSpec((tb, out_latent), lambda i: (i, 0)),
            scratch_shapes=[pltpu.VMEM((tb, d_in), jnp.float32)],      # packed x
        ),
        compiler_params=pltpu.CompilerParams(
            dimension_semantics=("parallel",),
        ),
        cost_estimate=pl.CostEstimate(
            flops=flops, transcendentals=0, bytes_accessed=bytes_accessed),
    )(state, action, w1, b1, w2, b2, w3, b3)

    return out


def init_params(key, latent_dim, action_dim, hidden=256, dtype=jnp.float32):
    """PyTorch-Linear-style init: U(-1/sqrt(fan_in), 1/sqrt(fan_in)).

    Weights stored as (in_features, out_features)."""
    d_in = latent_dim + action_dim
    keys = jax.random.split(key, 6)

    def lin(kw, kb, fan_in, fan_out):
        bound = 1.0 / jnp.sqrt(jnp.asarray(fan_in, jnp.float32))
        w = jax.random.uniform(kw, (fan_in, fan_out), dtype, -bound, bound)
        b = jax.random.uniform(kb, (1, fan_out), dtype, -bound, bound)
        return w, b

    w1, b1 = lin(keys[0], keys[1], d_in, hidden)
    w2, b2 = lin(keys[2], keys[3], hidden, hidden)
    w3, b3 = lin(keys[4], keys[5], hidden, latent_dim)
    return {"w1": w1, "b1": b1, "w2": w2, "b2": b2, "w3": w3, "b3": b3}


def _reference_forward(state, action, params, compute_dtype=jnp.bfloat16):
    """Pure-JAX reference mirroring the kernel's bf16-input / f32-accum math."""
    f32 = jnp.float32
    w1 = params["w1"].astype(compute_dtype)
    w2 = params["w2"].astype(compute_dtype)
    w3 = params["w3"].astype(compute_dtype)
    b1 = params["b1"].reshape(1, -1).astype(f32)
    b2 = params["b2"].reshape(1, -1).astype(f32)
    b3 = params["b3"].reshape(1, -1).astype(f32)
    x = jnp.concatenate([state, action], axis=1).astype(compute_dtype)
    h1 = jax.nn.relu(jnp.dot(x, w1, preferred_element_type=f32) + b1)
    h2 = jax.nn.relu(jnp.dot(h1.astype(compute_dtype), w2,
                             preferred_element_type=f32) + b2)
    return jnp.dot(h2.astype(compute_dtype), w3, preferred_element_type=f32) + b3


if __name__ == "__main__":
    latent_dim = 32
    action_dim = 8
    batch = 8

    key = jax.random.PRNGKey(0)
    k_params, k_state, k_action = jax.random.split(key, 3)

    params = init_params(k_params, latent_dim, action_dim)
    prepared = prepare_fwm_params(params)          # one-time weight prep (hoisted)

    state = jax.random.normal(k_state, (batch, latent_dim), jnp.float32)
    action = jax.random.normal(k_action, (batch, action_dim), jnp.float32)

    fwd = jax.jit(fwm_dynamics_forward)
    out = jax.block_until_ready(fwd(state, action, prepared))
    ref = _reference_forward(state, action, params)

    assert out.shape == (batch, latent_dim)
    max_err = jnp.max(jnp.abs(out - ref))
    assert jnp.allclose(out, ref, atol=5e-3, rtol=5e-3), (
        f"Pallas output mismatch vs reference: max abs err {max_err}")

    print("KERNEL_OK")
</pallas_src>

<mosaic_0001>
module attributes {stable_mosaic.version = 11 : i64} {
  func.func @_fwm_mlp_kernel(%arg0: i32, %arg1: memref<8x32xf32, #tpu.memory_space<vmem>>, %arg2: memref<8x8xf32, #tpu.memory_space<vmem>>, %arg3: memref<40x256xbf16, #tpu.memory_space<vmem>>, %arg4: memref<1x256xf32, #tpu.memory_space<vmem>>, %arg5: memref<256x256xbf16, #tpu.memory_space<vmem>>, %arg6: memref<1x256xf32, #tpu.memory_space<vmem>>, %arg7: memref<256x32xbf16, #tpu.memory_space<vmem>>, %arg8: memref<1x32xf32, #tpu.memory_space<vmem>>, %arg9: memref<8x32xf32, #tpu.memory_space<vmem>>, %arg10: memref<8x40xf32, #tpu.memory_space<vmem>>) attributes {dimension_semantics = [#tpu.dimension_semantics<parallel>], iteration_bounds = array<i64: 1>, scalar_prefetch = 0 : i64, scratch_operands = 1 : i64, tpu.core_type = #tpu.core_type<tc>, window_params = [{transform_indices = @transform_0, window_bounds = array<i64: 8, 32>}, {transform_indices = @transform_1, window_bounds = array<i64: 8, 8>}, {pipeline_mode = #tpu.pipeline_mode<synchronous>, transform_indices = @transform_2, window_bounds = array<i64: 40, 256>}, {pipeline_mode = #tpu.pipeline_mode<synchronous>, transform_indices = @transform_3, window_bounds = array<i64: 1, 256>}, {pipeline_mode = #tpu.pipeline_mode<synchronous>, transform_indices = @transform_4, window_bounds = array<i64: 256, 256>}, {pipeline_mode = #tpu.pipeline_mode<synchronous>, transform_indices = @transform_5, window_bounds = array<i64: 1, 256>}, {pipeline_mode = #tpu.pipeline_mode<synchronous>, transform_indices = @transform_6, window_bounds = array<i64: 256, 32>}, {pipeline_mode = #tpu.pipeline_mode<synchronous>, transform_indices = @transform_7, window_bounds = array<i64: 1, 32>}, {transform_indices = @transform_8, window_bounds = array<i64: 8, 32>}]} {
    %c0 = arith.constant 0 : index
    %c0_0 = arith.constant 0 : index
    %0 = vector.load %arg1[%c0, %c0_0] : memref<8x32xf32, #tpu.memory_space<vmem>>, vector<8x32xf32>
    %c0_1 = arith.constant 0 : index
    %c0_2 = arith.constant 0 : index
    %1 = vector.load %arg10[%c0_1, %c0_2] : memref<8x40xf32, #tpu.memory_space<vmem>>, vector<8x32xf32>
    tpu.vector_store %arg10[%c0_1, %c0_2], %0 {strides = array<i32>} : memref<8x40xf32, #tpu.memory_space<vmem>>, vector<8x32xf32>,
    %c0_3 = arith.constant 0 : index
    %c0_4 = arith.constant 0 : index
    %2 = vector.load %arg2[%c0_3, %c0_4] : memref<8x8xf32, #tpu.memory_space<vmem>>, vector<8x8xf32>
    %c0_5 = arith.constant 0 : index
    %c32 = arith.constant 32 : index
    %3 = vector.load %arg10[%c0_5, %c32] : memref<8x40xf32, #tpu.memory_space<vmem>>, vector<8x8xf32>
    tpu.vector_store %arg10[%c0_5, %c32], %2 {strides = array<i32>} : memref<8x40xf32, #tpu.memory_space<vmem>>, vector<8x8xf32>,
    %c0_6 = arith.constant 0 : index
    %c0_7 = arith.constant 0 : index
    %4 = vector.load %arg10[%c0_6, %c0_7] : memref<8x40xf32, #tpu.memory_space<vmem>>, vector<8x40xf32>
    %5 = arith.truncf %4 : vector<8x40xf32> to vector<8x40xbf16>
    %c0_8 = arith.constant 0 : index
    %c0_9 = arith.constant 0 : index
    %6 = vector.load %arg3[%c0_8, %c0_9] : memref<40x256xbf16, #tpu.memory_space<vmem>>, vector<40x256xbf16>
    %cst = arith.constant dense<0.000000e+00> : vector<8x256xf32>
    %7 = tpu.matmul %5, %6, %cst {dimension_numbers = #tpu.dot_dimension_numbers<[1], [0], [0], [1], [0, 0, 1, 1], [], []>} : vector<8x40xbf16>, vector<40x256xbf16>, vector<8x256xf32> -> vector<8x256xf32>
    %c0_10 = arith.constant 0 : index
    %c0_11 = arith.constant 0 : index
    %8 = vector.load %arg4[%c0_10, %c0_11] : memref<1x256xf32, #tpu.memory_space<vmem>>, vector<1x256xf32>
    %9 = vector.broadcast %8 : vector<1x256xf32> to vector<8x256xf32>
    %10 = arith.addf %7, %9 : vector<8x256xf32>
    %cst_12 = arith.constant 0.000000e+00 : f32
    %11 = vector.broadcast %cst_12 : f32 to vector<8x256xf32>
    %12 = arith.maximumf %10, %11 : vector<8x256xf32>
    %13 = arith.truncf %12 : vector<8x256xf32> to vector<8x256xbf16>
    %c0_13 = arith.constant 0 : index
    %c0_14 = arith.constant 0 : index
    %14 = vector.load %arg5[%c0_13, %c0_14] : memref<256x256xbf16, #tpu.memory_space<vmem>>, vector<256x256xbf16>
    %cst_15 = arith.constant dense<0.000000e+00> : vector<8x256xf32>
    %15 = tpu.matmul %13, %14, %cst_15 {dimension_numbers = #tpu.dot_dimension_numbers<[1], [0], [0], [1], [0, 0, 1, 1], [], []>} : vector<8x256xbf16>, vector<256x256xbf16>, vector<8x256xf32> -> vector<8x256xf32>
    %c0_16 = arith.constant 0 : index
    %c0_17 = arith.constant 0 : index
    %16 = vector.load %arg6[%c0_16, %c0_17] : memref<1x256xf32, #tpu.memory_space<vmem>>, vector<1x256xf32>
    %17 = vector.broadcast %16 : vector<1x256xf32> to vector<8x256xf32>
    %18 = arith.addf %15, %17 : vector<8x256xf32>
    %cst_18 = arith.constant 0.000000e+00 : f32
    %19 = vector.broadcast %cst_18 : f32 to vector<8x256xf32>
    %20 = arith.maximumf %18, %19 : vector<8x256xf32>
    %21 = arith.truncf %20 : vector<8x256xf32> to vector<8x256xbf16>
    %c0_19 = arith.constant 0 : index
    %c0_20 = arith.constant 0 : index
    %22 = vector.load %arg7[%c0_19, %c0_20] : memref<256x32xbf16, #tpu.memory_space<vmem>>, vector<256x32xbf16>
    %cst_21 = arith.constant dense<0.000000e+00> : vector<8x32xf32>
    %23 = tpu.matmul %21, %22, %cst_21 {dimension_numbers = #tpu.dot_dimension_numbers<[1], [0], [0], [1], [0, 0, 1, 1], [], []>} : vector<8x256xbf16>, vector<256x32xbf16>, vector<8x32xf32> -> vector<8x32xf32>
    %c0_22 = arith.constant 0 : index
    %c0_23 = arith.constant 0 : index
    %24 = vector.load %arg8[%c0_22, %c0_23] : memref<1x32xf32, #tpu.memory_space<vmem>>, vector<1x32xf32>
    %25 = vector.broadcast %24 : vector<1x32xf32> to vector<8x32xf32>
    %26 = arith.addf %23, %25 : vector<8x32xf32>
    %c0_24 = arith.constant 0 : index
    %c0_25 = arith.constant 0 : index
    %27 = vector.load %arg9[%c0_24, %c0_25] : memref<8x32xf32, #tpu.memory_space<vmem>>, vector<8x32xf32>
    tpu.vector_store %arg9[%c0_24, %c0_25], %26 {strides = array<i32>} : memref<8x32xf32, #tpu.memory_space<vmem>>, vector<8x32xf32>,
    return
  }
  func.func @transform_0(%arg0: i32) -> (i32, i32) {
    %c0_i32 = arith.constant 0 : i32
    %c0_i32_0 = arith.constant 0 : i32
    return %arg0, %c0_i32 : i32, i32
  }
  func.func @transform_1(%arg0: i32) -> (i32, i32) {
    %c0_i32 = arith.constant 0 : i32
    %c0_i32_0 = arith.constant 0 : i32
    return %arg0, %c0_i32 : i32, i32
  }
  func.func @transform_2(%arg0: i32) -> (i32, i32) {
    %c0_i32 = arith.constant 0 : i32
    %c0_i32_0 = arith.constant 0 : i32
    %c0_i32_1 = arith.constant 0 : i32
    return %c0_i32, %c0_i32_0 : i32, i32
  }
  func.func @transform_3(%arg0: i32) -> (i32, i32) {
    %c0_i32 = arith.constant 0 : i32
    %c0_i32_0 = arith.constant 0 : i32
    %c0_i32_1 = arith.constant 0 : i32
    return %c0_i32, %c0_i32_0 : i32, i32
  }
  func.func @transform_4(%arg0: i32) -> (i32, i32) {
    %c0_i32 = arith.constant 0 : i32
    %c0_i32_0 = arith.constant 0 : i32
    %c0_i32_1 = arith.constant 0 : i32
    return %c0_i32, %c0_i32_0 : i32, i32
  }
  func.func @transform_5(%arg0: i32) -> (i32, i32) {
    %c0_i32 = arith.constant 0 : i32
    %c0_i32_0 = arith.constant 0 : i32
    %c0_i32_1 = arith.constant 0 : i32
    return %c0_i32, %c0_i32_0 : i32, i32
  }
  func.func @transform_6(%arg0: i32) -> (i32, i32) {
    %c0_i32 = arith.constant 0 : i32
    %c0_i32_0 = arith.constant 0 : i32
    %c0_i32_1 = arith.constant 0 : i32
    return %c0_i32, %c0_i32_0 : i32, i32
  }
  func.func @transform_7(%arg0: i32) -> (i32, i32) {
    %c0_i32 = arith.constant 0 : i32
    %c0_i32_0 = arith.constant 0 : i32
    %c0_i32_1 = arith.constant 0 : i32
    return %c0_i32, %c0_i32_0 : i32, i32
  }
  func.func @transform_8(%arg0: i32) -> (i32, i32) {
    %c0_i32 = arith.constant 0 : i32
    %c0_i32_0 = arith.constant 0 : i32
    return %arg0, %c0_i32 : i32, i32
  }
}

</mosaic_0001>

<bundles_post_ra>
// kernel: fwm_dynamics_forward.1
= control target key start
LH: loop header
LB: loop body
LE: loop exit
PB: predicated region body
PF: predicated region fallthrough
CT: control target
= control target key end

     0   :  { %13 = vsyncpa [#allocation4], 0  ;;  %s1034_s0 = inlined_call_operand.vmem [shape: f32[8,32], index: 0, kind: input, shape index: {}]   ;;  %s1035_s1 = inlined_call_operand.vmem [shape: f32[8,8], index: 1, kind: input, shape index: {}]   ;;  %s1036_s2 = inlined_call_operand.vmem [shape: bf16[40,256], index: 2, kind: input, shape index: {}]   ;;  %s1037_s3 = inlined_call_operand.vmem [shape: f32[1,256], index: 3, kind: input, shape index: {}]   ;;  %s1038_s4 = inlined_call_operand.hbm [shape: bf16[256,256], index: 4, kind: input, shape index: {}]   ;;  %s1039_s5 = inlined_call_operand.vmem [shape: f32[1,256], index: 5, kind: input, shape index: {}]   ;;  %s1040_s6 = inlined_call_operand.vmem [shape: bf16[256,32], index: 6, kind: input, shape index: {}]   ;;  %s1041_s7 = inlined_call_operand.vmem [shape: f32[1,32], index: 7, kind: input, shape index: {}]   ;;  %s1042_s8 = inlined_call_operand.hbm [shape: f32[8,32], index: 8, kind: output, shape index: {}]  }
   0x1   :  { %14 = vsyncpa [#allocation5], 0  ;;  %s27_s29 = sshll.u32 %s1038_s4, 4  ;;  %s886_s30 = smov [#allocation3]   ;;  %s28_s29 = int_to_ptr.hbm [resolvable:$true] %s27_s29 }
   0x2   :  { %s29_s9 = sshll.u32 %s886_s30, 4  ;;  %s887_s10 = smov 128   ;;  %s30_s9 = int_to_ptr.vmem [resolvable:$true] %s29_s9 }
   0x3   :  { %s888_s11 = smov 8  }
   0x4   :  { %35 = dma.hbm_to_vmem [thread:$0]  %s28_s29, 4096, %s30_s9, [#allocation4], %s887_s10, %s887_s10, %s888_s11  }
   0x5   :  { %882 = dma.done.wait [#allocation4], 4096  }
   0x6   :  { %883 = vsyncadd [#allocation4], 4294963200  ;;  %vm48_vm0 = vcmask 261120   ;;  %v50_v0 = vld [vmem:[%s1035_s1] sm:$0xff]  ;;  %s889_s16 = smov 32   ;;  %vm99_vm1 = vcmask 1043456  }
   0x7   :  { %v47_v1 = vld [vmem:[%s1034_s0] sm:$0xff]  ;;  %52 = vrot.lane.b32.xlu0 %v50_v0, %s889_s16  ;;  %v576_v9 = vld [vmem:[%s1036_s2 + $0x10] sm:$0xf]  ;;  %v779_v10 = vld [vmem:[%s1036_s2 + $0x14] sm:$0xf0]  ;;  %vm55_vm2 = vcmask 326912  }
   0x8   :  { %49 = vst.msk [vmem:[#allocation2] sm:$0xff] %vm48_vm0, %v47_v1  ;;  %v63_v2 = vld [vmem:[%s1036_s2 + $0x20] sm:$0xff]  ;;  %v778_v11 = vld [vmem:[%s1036_s2 + $0x14] sm:$0xf]  ;;  %v577_v12 = vor.u32 %v779_v10, %v576_v9  ;;  %v578_v13 = vld [vmem:[%s1036_s2 + $0x18] sm:$0xf0] }
   0x9   :  { %v83_v3 = vunpack.c.l.b16 %v63_v2  ;;  %v84_v4 = vunpack.c.h.b16 %v63_v2  ;;  %v568_v14 = vld [vmem:[%s1036_s2] sm:$0xf]  ;;  %v777_v15 = vld [vmem:[%s1036_s2 + $0x4] sm:$0xf0]  ;;  %v581_v16 = vor.u32 %v778_v11, %v578_v13  ;;  %v776_v17 = vld [vmem:[%s1036_s2 + $0x4] sm:$0xf] }
   0xa   :  { %v570_v18 = vld [vmem:[%s1036_s2 + $0x8] sm:$0xf0]  ;;  %v569_v19 = vor.u32 %v777_v15, %v568_v14  ;;  %v642_v21 = vld [vmem:[#allocation3 + $0x70] sm:$0xf]  ;;  %v795_v22 = vld [vmem:[#allocation3 + $0x74] sm:$0xf0] }
   0xb   :  { %v89_v5 = vpack.c.b16 %v83_v3, %v83_v3  ;;  %v90_v6 = vpack.c.b16 %v84_v4, %v84_v4  ;;  %v573_v20 = vor.u32 %v776_v17, %v570_v18  ;;  %v706_v23 = vld [vmem:[#allocation3 + $0xf0] sm:$0xf]  ;;  %v643_v24 = vor.u32 %v795_v22, %v642_v21  ;;  %v811_v25 = vld [vmem:[#allocation3 + $0xf4] sm:$0xf0]  ;;  %v794_v26 = vld [vmem:[#allocation3 + $0x74] sm:$0xf] }
   0xc   :  { %v644_v27 = vld [vmem:[#allocation3 + $0x78] sm:$0xf0]  ;;  %v707_v28 = vor.u32 %v811_v25, %v706_v23  ;;  %v810_v30 = vld [vmem:[#allocation3 + $0xf4] sm:$0xf]  ;;  %v634_v32 = vld [vmem:[#allocation3 + $0x60] sm:$0xf] }
   0xd   :  { %v101_v7 = vsel %vm99_vm1, %v89_v5, 0  ;;  %v104_v8 = vsel %vm99_vm1, %v90_v6, 0  ;;  %v647_v29 = vor.u32 %v794_v26, %v644_v27  ;;  %v708_v31 = vld [vmem:[#allocation3 + $0xf8] sm:$0xf0]  ;;  %334 = vmatpush.bf16.msra.mxu2 %v643_v24  ;;  %v793_v34 = vld [vmem:[#allocation3 + $0x64] sm:$0xf0] }
   0xe   :  { %111 = vmatpush.bf16.msra.mxu0 %v101_v7  ;;  %124 = vmatpush.bf16.msra.mxu1 %v104_v8  ;;  %v711_v33 = vor.u32 %v810_v30, %v708_v31  ;;  %v698_v35 = vld [vmem:[#allocation3 + $0xe0] sm:$0xf]  ;;  %v809_v36 = vld [vmem:[#allocation3 + $0xe4] sm:$0xf0]  ;;  %v635_v37 = vor.u32 %v793_v34, %v634_v32  ;;  %v792_v39 = vld [vmem:[#allocation3 + $0x64] sm:$0xf] }
   0xf   :  { %347 = vmatpush.bf16.msra.mxu3 %v707_v28  ;;  %v699_v38 = vor.u32 %v809_v36, %v698_v35  ;;  %v636_v40 = vld [vmem:[#allocation3 + $0x68] sm:$0xf0]  ;;  %v808_v41 = vld [vmem:[#allocation3 + $0xe4] sm:$0xf]  ;;  %v626_v44 = vld [vmem:[#allocation3 + $0x50] sm:$0xf] }
  0x10   :  { %v639_v42 = vor.u32 %v792_v39, %v636_v40  ;;  %v700_v43 = vld [vmem:[#allocation3 + $0xe8] sm:$0xf0]  ;;  %v791_v45 = vld [vmem:[#allocation3 + $0x54] sm:$0xf0]  ;;  %v690_v47 = vld [vmem:[#allocation3 + $0xd0] sm:$0xf] }
  0x11   :  { %v703_v46 = vor.u32 %v808_v41, %v700_v43  ;;  %v807_v48 = vld [vmem:[#allocation3 + $0xd4] sm:$0xf0]  ;;  %v790_v49 = vld [vmem:[#allocation3 + $0x54] sm:$0xf]  ;;  %335 = vmatpush.bf16.msra.mxu2 %v635_v37  ;;  %v627_v50 = vor.u32 %v791_v45, %v626_v44  ;;  %v628_v51 = vld [vmem:[#allocation3 + $0x58] sm:$0xf0] }
  0x12   :  { %112 = vmatpush.bf16.msra.mxu0 %v577_v12  ;;  %125 = vmatpush.bf16.msra.mxu1 %v581_v16  ;;  %v806_v52 = vld [vmem:[#allocation3 + $0xd4] sm:$0xf]  ;;  %v692_v53 = vld [vmem:[#allocation3 + $0xd8] sm:$0xf0]  ;;  %v691_v54 = vor.u32 %v807_v48, %v690_v47  ;;  %v631_v55 = vor.u32 %v790_v49, %v628_v51  ;;  %v618_v56 = vld [vmem:[#allocation3 + $0x40] sm:$0xf] }
  0x13   :  { %348 = vmatpush.bf16.msra.mxu3 %v699_v38  ;;  %v789_v57 = vld [vmem:[#allocation3 + $0x44] sm:$0xf0]  ;;  %v682_v58 = vld [vmem:[#allocation3 + $0xc0] sm:$0xf]  ;;  %v695_v59 = vor.u32 %v806_v52, %v692_v53  ;;  %v788_v61 = vld [vmem:[#allocation3 + $0x44] sm:$0xf] }
  0x14   :  { %v805_v60 = vld [vmem:[#allocation3 + $0xc4] sm:$0xf0]  ;;  %v620_v62 = vld [vmem:[#allocation3 + $0x48] sm:$0xf0]  ;;  %v804_v63 = vld [vmem:[#allocation3 + $0xc4] sm:$0xf]  ;;  %v619_v1 = vor.u32 %v789_v57, %v618_v56 }
  0x15   :  { %v684_v0 = vld [vmem:[#allocation3 + $0xc8] sm:$0xf0]  ;;  %336 = vmatpush.bf16.msra.mxu2 %v627_v50  ;;  %v683_v2 = vor.u32 %v805_v60, %v682_v58  ;;  %v623_v3 = vor.u32 %v788_v61, %v620_v62  ;;  %v610_v4 = vld [vmem:[#allocation3 + $0x30] sm:$0xf]  ;;  %v787_v5 = vld [vmem:[#allocation3 + $0x34] sm:$0xf0] }
  0x16   :  { %113 = vmatpush.bf16.msra.mxu0 %v569_v19  ;;  %126 = vmatpush.bf16.msra.mxu1 %v573_v20  ;;  %v674_v6 = vld [vmem:[#allocation3 + $0xb0] sm:$0xf]  ;;  %v687_v7 = vor.u32 %v804_v63, %v684_v0  ;;  %v803_v8 = vld [vmem:[#allocation3 + $0xb4] sm:$0xf0]  ;;  %v786_v9 = vld [vmem:[#allocation3 + $0x34] sm:$0xf]  ;;  %v611_v13 = vor.u32 %v787_v5, %v610_v4 }
  0x17   :  { %349 = vmatpush.bf16.msra.mxu3 %v691_v54  ;;  %v612_v10 = vld [vmem:[#allocation3 + $0x38] sm:$0xf0]  ;;  %v802_v11 = vld [vmem:[#allocation3 + $0xb4] sm:$0xf]  ;;  %v675_v14 = vor.u32 %v803_v8, %v674_v6  ;;  %v602_v16 = vld [vmem:[#allocation3 + $0x20] sm:$0xf] }
  0x18   :  { %v676_v12 = vld [vmem:[#allocation3 + $0xb8] sm:$0xf0]  ;;  %v615_v15 = vor.u32 %v786_v9, %v612_v10  ;;  %v785_v17 = vld [vmem:[#allocation3 + $0x24] sm:$0xf0]  ;;  %v666_v18 = vld [vmem:[#allocation3 + $0xa0] sm:$0xf] }
  0x19   :  { %337 = vmatpush.bf16.msra.mxu2 %v619_v1  ;;  %v679_v19 = vor.u32 %v802_v11, %v676_v12  ;;  %v801_v20 = vld [vmem:[#allocation3 + $0xa4] sm:$0xf0]  ;;  %v784_v21 = vld [vmem:[#allocation3 + $0x24] sm:$0xf]  ;;  %v604_v22 = vld [vmem:[#allocation3 + $0x28] sm:$0xf0]  ;;  %v603_v25 = vor.u32 %v785_v17, %v602_v16 }
  0x1a   :  { %360 = vmatpush.bf16.msrb.mxu0 %v647_v29  ;;  %373 = vmatpush.bf16.msrb.mxu1 %v711_v33  ;;  %v800_v23 = vld [vmem:[#allocation3 + $0xa4] sm:$0xf]  ;;  %v668_v24 = vld [vmem:[#allocation3 + $0xa8] sm:$0xf0]  ;;  %v667_v26 = vor.u32 %v801_v20, %v666_v18  ;;  %v607_v27 = vor.u32 %v784_v21, %v604_v22  ;;  %vm95_vm3 = vcmask 326656   ;;  %v827_v56 = vld [vmem:[%s1040_s6 + $0x78] sm:$0xff] }
  0x1b   :  { %350 = vmatpush.bf16.msra.mxu3 %v683_v2  ;;  %v671_v29 = vor.u32 %v800_v23, %v668_v24  ;;  %v594_v32 = vld [vmem:[#allocation3 + $0x10] sm:$0xf]  ;;  %v783_v33 = vld [vmem:[#allocation3 + $0x14] sm:$0xf0]  ;;  %v782_v37 = vld [vmem:[#allocation3 + $0x14] sm:$0xf] }
  0x1c   :  { %v658_v34 = vld [vmem:[#allocation3 + $0x90] sm:$0xf]  ;;  %v595_v35 = vor.u32 %v783_v33, %v594_v32  ;;  %v799_v36 = vld [vmem:[#allocation3 + $0x94] sm:$0xf0]  ;;  %v596_v38 = vld [vmem:[#allocation3 + $0x18] sm:$0xf0] }
  0x1d   :  { %338 = vmatpush.bf16.msra.mxu2 %v611_v13  ;;  %v659_v39 = vor.u32 %v799_v36, %v658_v34  ;;  %v599_v40 = vor.u32 %v782_v37, %v596_v38  ;;  %v798_v41 = vld [vmem:[#allocation3 + $0x94] sm:$0xf]  ;;  %v586_v44 = vld [vmem:[#allocation3] sm:$0xf]  ;;  %v781_v45 = vld [vmem:[#allocation3 + $0x4] sm:$0xf0] }
  0x1e   :  { %361 = vmatpush.bf16.msrb.mxu0 %v639_v42  ;;  %374 = vmatpush.bf16.msrb.mxu1 %v703_v46  ;;  %v660_v42 = vld [vmem:[#allocation3 + $0x98] sm:$0xf0]  ;;  %v650_v46 = vld [vmem:[#allocation3 + $0x80] sm:$0xf]  ;;  %v587_v47 = vor.u32 %v781_v45, %v586_v44  ;;  %v797_v48 = vld [vmem:[#allocation3 + $0x84] sm:$0xf0] }
  0x1f   :  { %351 = vmatpush.bf16.msra.mxu3 %v675_v14  ;;  %v663_v43 = vor.u32 %v798_v41, %v660_v42  ;;  %v780_v49 = vld [vmem:[#allocation3 + $0x4] sm:$0xf]  ;;  %v588_v50 = vld [vmem:[#allocation3 + $0x8] sm:$0xf0]  ;;  %v651_v51 = vor.u32 %v797_v48, %v650_v46  ;;  %v819_v57 = vld [vmem:[%s1040_s6 + $0x38] sm:$0xff]  ;;  %s890_s17 = smov [#allocation6]  }
  0x20   :  { %v591_v52 = vor.u32 %v780_v49, %v588_v50  ;;  %v796_v53 = vld [vmem:[#allocation3 + $0x84] sm:$0xf]  ;;  %v652_v54 = vld [vmem:[#allocation3 + $0x88] sm:$0xf0]  ;;  %v824_v62 = vld [vmem:[%s1040_s6 + $0x60] sm:$0xff]  ;;  %s554_s1 = sshll.u32 %s890_s17, 4  ;;  %s555_s1 = int_to_ptr.vmem [resolvable:$true] %s554_s1 }
  0x21   :  { %339 = vmatpush.bf16.msra.mxu2 %v603_v25  ;;  %v826_v58 = vld [vmem:[%s1040_s6 + $0x70] sm:$0xff]  ;;  %v825_v60 = vld [vmem:[%s1040_s6 + $0x68] sm:$0xff]  ;;  %v816_v63 = vld [vmem:[%s1040_s6 + $0x20] sm:$0xff]  ;;  %s556_s19 = sshll.u32 %s1042_s8, 4  ;;  %s557_s19 = int_to_ptr.hbm [resolvable:$true] %s556_s19 }
  0x22   :  { %362 = vmatpush.bf16.msrb.mxu0 %v631_v55  ;;  %375 = vmatpush.bf16.msrb.mxu1 %v695_v59  ;;  %v655_v55 = vor.u32 %v796_v53, %v652_v54  ;;  %v818_v59 = vld [vmem:[%s1040_s6 + $0x30] sm:$0xff]  ;;  %v817_v61 = vld [vmem:[%s1040_s6 + $0x28] sm:$0xff]  ;;  %v823_v0 = vld [vmem:[%s1040_s6 + $0x58] sm:$0xff] }
  0x23   :  { %352 = vmatpush.bf16.msra.mxu3 %v667_v26  ;;  %v64_v1 = vld [vmem:[%s1037_s3] sm:$0x3]  ;;  %v822_v2 = vld [vmem:[%s1040_s6 + $0x50] sm:$0xff]  ;;  %v821_v16 = vld [vmem:[%s1040_s6 + $0x48] sm:$0xff] }
  0x24   :  { %v67_v4 = vperm.slane %v64_v1, 1  ;;  %v814_v17 = vld [vmem:[%s1040_s6 + $0x10] sm:$0xff]  ;;  %v820_v18 = vld [vmem:[%s1040_s6 + $0x40] sm:$0xff] }
  0x25   :  { %340 = vmatpush.bf16.msra.mxu2 %v595_v35  ;;  %v812_v20 = vld [vmem:[%s1040_s6] sm:$0xff] }
  0x26   :  { %363 = vmatpush.bf16.msrb.mxu0 %v623_v3  ;;  %376 = vmatpush.bf16.msrb.mxu1 %v687_v7  ;;  %v66_v3 = vperm.slane %v64_v1, 0  ;;  %v168_v21 = vld [vmem:[%s1039_s5] sm:$0x3] }
  0x27   :  { %353 = vmatpush.bf16.msra.mxu3 %v659_v39  ;;  %v171_v22 = vperm.slane %v168_v21, 1  ;;  %v170_v26 = vperm.slane %v168_v21, 0  ;;  %v833_v41 = vld [vmem:[%s1041_s7] ss:$0 sm:$0xff] }
  0x29   :  { %341 = vmatpush.bf16.msra.mxu2 %v587_v47 }
  0x2a   :  { %364 = vmatpush.bf16.msrb.mxu0 %v615_v15  ;;  %377 = vmatpush.bf16.msrb.mxu1 %v679_v19  ;;  %v815_v15 = vld [vmem:[%s1040_s6 + $0x18] sm:$0xff]  ;;  %v813_v19 = vld [vmem:[%s1040_s6 + $0x8] sm:$0xff] }
  0x2b   :  { %354 = vmatpush.bf16.msra.mxu3 %v651_v51 }
  0x2d   :  { %522 = vmatpush.bf16.msrb.mxu2 %v819_v57 }
  0x2e   :  { %365 = vmatpush.bf16.msrb.mxu0 %v607_v27  ;;  %378 = vmatpush.bf16.msrb.mxu1 %v671_v29 }
  0x2f   :  { %535 = vmatpush.bf16.msrb.mxu3 %v827_v56 }
  0x31   :  { %523 = vmatpush.bf16.msrb.mxu2 %v818_v59 }
  0x32   :  { %366 = vmatpush.bf16.msrb.mxu0 %v599_v40  ;;  %379 = vmatpush.bf16.msrb.mxu1 %v663_v43 }
  0x33   :  { %536 = vmatpush.bf16.msrb.mxu3 %v826_v58 }
  0x35   :  { %524 = vmatpush.bf16.msrb.mxu2 %v817_v61 }
  0x36   :  { %367 = vmatpush.bf16.msrb.mxu0 %v591_v52  ;;  %380 = vmatpush.bf16.msrb.mxu1 %v655_v55 }
  0x37   :  { %537 = vmatpush.bf16.msrb.mxu3 %v825_v60 }
  0x39   :  { %525 = vmatpush.bf16.msrb.mxu2 %v816_v63 }
  0x3b   :  { %538 = vmatpush.bf16.msrb.mxu3 %v824_v62 }
  0x3d   :  { %526 = vmatpush.bf16.msrb.mxu2 %v815_v15 }
  0x3f   :  { %539 = vmatpush.bf16.msrb.mxu3 %v823_v0 }
  0x41   :  { %527 = vmatpush.bf16.msrb.mxu2 %v814_v17 }
  0x43   :  { %540 = vmatpush.bf16.msrb.mxu3 %v822_v2 }
  0x45   :  { %528 = vmatpush.bf16.msrb.mxu2 %v813_v19 }
  0x47   :  { %541 = vmatpush.bf16.msrb.mxu3 %v821_v16 }
  0x49   :  { %529 = vmatpush.bf16.msrb.mxu2 %v812_v20 }
  0x4b   :  { %542 = vmatpush.bf16.msrb.mxu3 %v820_v18 }
  0x79   :  { %v53_v28 = vpop.permute.xlu0 %52 }
  0x7a   :  { %56 = vst.msk [vmem:[#allocation2] sm:$0xff] %vm55_vm2, %v53_v28 }
  0x81   :  { %v57_v30 = vld [vmem:[#allocation2] sm:$0xff] }
  0x82   :  { %v58_v31 = vpack.c.bf16 %v57_v30, %v57_v30 }
  0x84   :  { %582 = vmatmul.msk.bf16.vlgmr.msra.gmra.mxu0 %vm95_vm3, %v58_v31  ;;  %583 = vmatmul.msk.bf16.vlgmr.msra.gmra.mxu1 %vm95_vm3, %v58_v31 }
 0x101   :  { %v115_v5 = vpop.f32.mrf.mxu0  ;;  %v128_v6 = vpop.f32.mrf.mxu1 }
 0x102   :  { %v116_v7 = vadd.f32 %v115_v5, %v66_v3  ;;  %v129_v8 = vadd.f32 %v128_v6, %v67_v4 }
 0x104   :  { %v132_v9 = vmax.f32 %v116_v7, 0.0  ;;  %v133_v10 = vmax.f32 %v129_v8, 0.0 }
 0x106   :  { %v134_v11 = vpack.c.bf16 %v132_v9, %v132_v9  ;;  %v135_v12 = vpack.c.bf16 %v133_v10, %v133_v10 }
 0x108   :  { %342 = vmatmul.bf16.vlgmr.msra.gmra.mxu2 %v134_v11  ;;  %355 = vmatmul.bf16.vlgmr.msra.gmra.mxu3 %v135_v12 }
 0x109   :  { %368 = vmatmul.bf16.vlgmr.msrb.gmra.mxu0 %v134_v11  ;;  %381 = vmatmul.bf16.vlgmr.msrb.gmra.mxu1 %v135_v12  ;;  %v117_v13 = vpop.f32.mrf.mxu0  ;;  %v130_v14 = vpop.f32.mrf.mxu1 }
 0x186   :  { %v369_v23 = vpop.f32.mrf.mxu0  ;;  %v382_v24 = vpop.f32.mrf.mxu1 }
 0x187   :  { %v370_v25 = vadd.f32 %v369_v23, %v171_v22 }
 0x189   :  { %v383_v27 = vadd.f32 %v382_v24, %v370_v25 }
 0x18b   :  { %v387_v28 = vmax.f32 %v383_v27, 0.0  ;;  %v343_v29 = vpop.f32.mrf.mxu2  ;;  %v356_v30 = vpop.f32.mrf.mxu3 }
 0x18c   :  { %v344_v31 = vadd.f32 %v343_v29, %v170_v26 }
 0x18d   :  { %v389_v32 = vpack.c.bf16 %v387_v28, %v387_v28 }
 0x18e   :  { %v357_v33 = vadd.f32 %v356_v30, %v344_v31  ;;  %v371_v34 = vpop.f32.mrf.mxu0  ;;  %v384_v35 = vpop.f32.mrf.mxu1 }
 0x18f   :  { %543 = vmatmul.bf16.vlgmr.msrb.gmra.mxu3 %v389_v32 }
 0x190   :  { %v386_v36 = vmax.f32 %v357_v33, 0.0 }
 0x192   :  { %v388_v37 = vpack.c.bf16 %v386_v36, %v386_v36 }
 0x193   :  { %v345_v38 = vpop.f32.mrf.mxu2  ;;  %v358_v39 = vpop.f32.mrf.mxu3 }
 0x194   :  { %530 = vmatmul.bf16.vlgmr.msrb.gmra.mxu2 %v388_v37 }
 0x212   :  { %v544_v40 = vpop.f32.mrf.mxu3 }
 0x217   :  { %v531_v42 = vpop.f32.mrf.mxu2 }
 0x218   :  { %v532_v43 = vadd.f32 %v833_v41, %v531_v42 }
 0x21a   :  { %v545_v44 = vadd.f32 %v544_v40, %v532_v43  ;;  %v546_v45 = vpop.f32.mrf.mxu3 }
 0x21c   :  { %548 = vst.msk [vmem:[#allocation6] sm:$0xff] %vm48_vm0, %v545_v44 }
 0x21d   :  { %559 = dma.vmem_to_hbm [thread:$0]  %s555_s1, 128, %s557_s19, [#allocation5]  }
 0x21f   :  { %v533_v46 = vpop.f32.mrf.mxu2 }
 0x220   :  { %884 = dma.done.wait [#allocation5], 128  }
 0x221   :  { %885 = vsyncadd [#allocation5], 4294967168 }
 0x222   :  { %564 = vsyncpa [#allocation4], 1 }
 0x223   :  { %565 = vsyncpa [#allocation5], 1 }

</bundles_post_ra>
